<compile_context>
chip_gen: v6e
topology: v6e:2x2x1
jax: 0.10.0
libtpu: 0.0.40
codegen_flags: <defaults>
</compile_context>

<pallas_src>
import functools

import jax
import jax.numpy as jnp
from jax import lax
from jax.experimental import pallas as pl
from jax.experimental.pallas import tpu as pltpu  # noqa: F401  (TPU backend)

_LANE = 128  # padded hidden / output width (lane-dense)


def _round_up(v, m):
    return (v + m - 1) // m * m


# ----------------------------- Pallas kernel --------------------------------
def _make_gcn_kernel(fin, r_w2, hp):
    """Kernel factory closing over static weight-slab offsets / feature dims."""
    inv_sqrt2 = 0.7071067811865476

    def kernel(a_ref, x_ref, w_ref, b_ref, o_ref):
        a = a_ref[...]                       # (M, M)  bf16, block-diag A_hat (norm folded)
        x = x_ref[...]                       # (M, Fin) bf16, packed node features

        w1 = w_ref[0:fin, :]                 # (Fin, 128) bf16
        w2 = w_ref[r_w2:r_w2 + hp, :]        # (128, 128) bf16
        b1 = b_ref[0:1, :]                   # (1, 128)  f32
        b2 = b_ref[1:2, :]                   # (1, 128)  f32

        # ---- conv1: A_hat @ (X W1) + b1 ----
        xw1 = jnp.dot(x, w1, preferred_element_type=jnp.float32)          # (M, 128)
        h = jnp.dot(a, xw1.astype(jnp.bfloat16),
                    preferred_element_type=jnp.float32) + b1

        # ---- exact erf GELU (torch.nn.GELU default), f32 ----
        h = 0.5 * h * (1.0 + lax.erf(h * inv_sqrt2))

        # ---- conv2: A_hat @ (H W2) + b2 ----
        hw2 = jnp.dot(h.astype(jnp.bfloat16), w2,
                      preferred_element_type=jnp.float32)
        y = jnp.dot(a, hw2.astype(jnp.bfloat16),
                    preferred_element_type=jnp.float32) + b2
        o_ref[...] = y.astype(o_ref.dtype)   # lane-dense (M, 128) unmasked store

    return kernel


def gcn_net_forward(a_hat_bf16, x_flat_bf16, w_slab, b_slab, *, fin):
    """Whole packed batch in one kernel invocation (no grid)."""
    m_pad = a_hat_bf16.shape[0]
    hp = w_slab.shape[1]
    r_w2 = _round_up(fin, 16)  # bf16 sublane-tile aligned slice start

    kernel = _make_gcn_kernel(fin, r_w2, hp)

    flops = 2 * m_pad * (fin * hp + 2 * m_pad * hp + hp * hp)
    transcendentals = m_pad * hp
    bytes_accessed = (2 * a_hat_bf16.size + 2 * x_flat_bf16.size
                      + 2 * w_slab.size + 4 * b_slab.size + 4 * m_pad * hp)

    return pl.pallas_call(
        kernel,
        out_shape=jax.ShapeDtypeStruct((m_pad, hp), jnp.float32),
        cost_estimate=pl.CostEstimate(
            flops=flops,
            transcendentals=transcendentals,
            bytes_accessed=bytes_accessed,
        ),
    )(a_hat_bf16, x_flat_bf16, w_slab, b_slab)


# ------------------------------- glue (JAX) ---------------------------------
def _build_blockdiag_ahat(edge_index, num_nodes, m_pad):
    """Block-diagonal normalized adjacency D^{-1/2}(A+I)D^{-1/2} in f32.

    edge_index: (G, 2, E) with per-graph node ids in [0, num_nodes).
    Padding rows/cols beyond G*num_nodes are all-zero.
    """
    g = edge_index.shape[0]
    n = num_nodes
    m = g * n
    offs = (jnp.arange(g, dtype=edge_index.dtype) * n)[:, None]
    src = (edge_index[:, 0, :] + offs).reshape(-1)
    dst = (edge_index[:, 1, :] + offs).reshape(-1)
    loop = jnp.arange(m, dtype=edge_index.dtype)
    src = jnp.concatenate([src, loop])
    dst = jnp.concatenate([dst, loop])
    adj = jnp.zeros((m_pad, m_pad), jnp.float32).at[dst, src].add(1.0)
    deg = jnp.sum(adj, axis=1)
    dinv = jnp.where(deg > 0.0, lax.rsqrt(deg), 0.0)
    return adj * dinv[:, None] * dinv[None, :]


def init_params(key, input_dim, hidden_dim, output_dim):
    """Deterministic glorot-uniform weights, zero biases (GCNConv defaults)."""
    k1, k2 = jax.random.split(key)

    def glorot(k, fan_in, fan_out):
        limit = jnp.sqrt(6.0 / (fan_in + fan_out))
        return jax.random.uniform(k, (fan_in, fan_out), jnp.float32, -limit, limit)

    w1 = glorot(k1, input_dim, hidden_dim)
    b1 = jnp.zeros((hidden_dim,), jnp.float32)
    w2 = glorot(k2, hidden_dim, output_dim)
    b2 = jnp.zeros((output_dim,), jnp.float32)
    return w1, b1, w2, b2


def pack_weights(w1, w2, hp=_LANE):
    """Zero-padded bf16 weight slab [w1 | w2], w2 section 16-row aligned."""
    fin, h = w1.shape
    fout = w2.shape[1]
    r_w2 = _round_up(fin, 16)
    rows = r_w2 + hp
    slab = jnp.zeros((rows, hp), jnp.float32)
    slab = slab.at[:fin, :h].set(w1)
    slab = slab.at[r_w2:r_w2 + h, :fout].set(w2)
    return slab.astype(jnp.bfloat16)


def pack_biases(b1, b2, hp=_LANE):
    """Tiny f32 sidecar: row 0 = b1, row 1 = b2 (lane-padded to 128)."""
    slab = jnp.zeros((8, hp), jnp.float32)
    slab = slab.at[0, :b1.shape[0]].set(b1)
    slab = slab.at[1, :b2.shape[0]].set(b2)
    return slab


@functools.partial(jax.jit, static_argnames=("output_dim",))
def gcn_net(x, edge_index, target, w_slab, b_slab, *, output_dim):
    """x: (G,N,Fin), edge_index: (G,2,E), target: (G,N) -> (out (G,N,Fout), target)."""
    g, n, fin = x.shape
    m = g * n
    m_pad = _round_up(m, _LANE)
    a_hat = _build_blockdiag_ahat(edge_index, n, m_pad)          # f32 norm, then
    a_hat = a_hat.astype(jnp.bfloat16)                           # single cast to bf16
    x_flat = jnp.zeros((m_pad, fin), jnp.float32).at[:m, :].set(x.reshape(m, fin))
    out_padded = gcn_net_forward(a_hat, x_flat.astype(jnp.bfloat16),
                                 w_slab, b_slab, fin=fin)
    out = out_padded[:m, :output_dim].reshape(g, n, output_dim)
    return out, target


# --------------------------------- main --------------------------------------
if __name__ == "__main__":
    key = jax.random.PRNGKey(0)
    k_x, k_e, k_y, k_p = jax.random.split(key, 4)

    num_graphs = 8
    num_nodes = 16
    input_dim, hidden_dim, output_dim = 8, 32, 4
    num_edges = 24

    # deterministic synthetic batched graph data (data.x, data.edge_index, data.y)
    x = jax.random.normal(k_x, (num_graphs, num_nodes, input_dim), jnp.float32)
    edge_index = jax.random.randint(
        k_e, (num_graphs, 2, num_edges), 0, num_nodes, jnp.int32)
    target = jax.random.randint(k_y, (num_graphs, num_nodes), 0, output_dim, jnp.int32)

    w1, b1, w2, b2 = init_params(k_p, input_dim, hidden_dim, output_dim)
    w_slab = pack_weights(w1, w2)
    b_slab = pack_biases(b1, b2)

    out, tgt = gcn_net(x, edge_index, target, w_slab, b_slab, output_dim=output_dim)
    jax.block_until_ready((out, tgt))

    # f32 reference (plain JAX) for a loose correctness check (bf16 MXU operands).
    m = num_graphs * num_nodes
    m_pad = _round_up(m, _LANE)
    a_hat_f32 = _build_blockdiag_ahat(edge_index, num_nodes, m_pad)[:m, :m]
    x_flat = x.reshape(m, input_dim)
    h_ref = a_hat_f32 @ (x_flat @ w1) + b1
    h_ref = 0.5 * h_ref * (1.0 + lax.erf(h_ref * 0.7071067811865476))
    ref = (a_hat_f32 @ (h_ref @ w2) + b2).reshape(num_graphs, num_nodes, output_dim)

    assert out.shape == (num_graphs, num_nodes, output_dim)
    assert tgt.shape == (num_graphs, num_nodes)
    assert bool(jnp.allclose(out, ref, atol=0.1, rtol=0.1)), float(
        jnp.max(jnp.abs(out - ref)))
    print("KERNEL_OK")
</pallas_src>

<mosaic_0001>
module attributes {stable_mosaic.version = 11 : i64} {
  func.func private @main(%arg0: i32) attributes {dimension_semantics = [#tpu.dimension_semantics<core_parallel>], iteration_bounds = array<i64: 2>, tpu.core_type = #tpu.core_type<sc_scalar_subcore>, window_params = []} {
    return
  }
}

module attributes {stable_mosaic.version = 11 : i64} {
  func.func private @main(%arg0: i32) attributes {dimension_semantics = [#tpu.dimension_semantics<core_parallel>], iteration_bounds = array<i64: 2>, tpu.core_type = #tpu.core_type<sc_scalar_subcore>, window_params = []} {
    return
  }
}

module attributes {stable_mosaic.version = 11 : i64} {
  func.func @kernel(%arg0: memref<128x128xbf16, #tpu.memory_space<vmem>>, %arg1: memref<128x8xbf16, #tpu.memory_space<vmem>>, %arg2: memref<144x128xbf16, #tpu.memory_space<vmem>>, %arg3: memref<8x128xf32, #tpu.memory_space<vmem>>, %arg4: memref<128x128xf32, #tpu.memory_space<vmem>>) attributes {dimension_semantics = [], scalar_prefetch = 0 : i64, scratch_operands = 0 : i64, tpu.core_type = #tpu.core_type<tc>} {
    %c0 = arith.constant 0 : index
    %c0_0 = arith.constant 0 : index
    %0 = vector.load %arg0[%c0, %c0_0] : memref<128x128xbf16, #tpu.memory_space<vmem>>, vector<128x128xbf16>
    %c0_1 = arith.constant 0 : index
    %c0_2 = arith.constant 0 : index
    %1 = vector.load %arg1[%c0_1, %c0_2] : memref<128x8xbf16, #tpu.memory_space<vmem>>, vector<128x8xbf16>
    %c0_3 = arith.constant 0 : index
    %c0_4 = arith.constant 0 : index
    %2 = vector.load %arg2[%c0_3, %c0_4] : memref<144x128xbf16, #tpu.memory_space<vmem>>, vector<8x128xbf16>
    %c16 = arith.constant 16 : index
    %c0_5 = arith.constant 0 : index
    %3 = vector.load %arg2[%c16, %c0_5] : memref<144x128xbf16, #tpu.memory_space<vmem>>, vector<128x128xbf16>
    %c0_6 = arith.constant 0 : index
    %c0_7 = arith.constant 0 : index
    %4 = vector.load %arg3[%c0_6, %c0_7] : memref<8x128xf32, #tpu.memory_space<vmem>>, vector<1x128xf32>
    %c1 = arith.constant 1 : index
    %c0_8 = arith.constant 0 : index
    %5 = vector.load %arg3[%c1, %c0_8] : memref<8x128xf32, #tpu.memory_space<vmem>>, vector<1x128xf32>
    %cst = arith.constant dense<0.000000e+00> : vector<128x128xf32>
    %6 = tpu.matmul %1, %2, %cst {dimension_numbers = #tpu.dot_dimension_numbers<[1], [0], [0], [1], [0, 0, 1, 1], [], []>} : vector<128x8xbf16>, vector<8x128xbf16>, vector<128x128xf32> -> vector<128x128xf32>
    %7 = arith.truncf %6 : vector<128x128xf32> to vector<128x128xbf16>
    %cst_9 = arith.constant dense<0.000000e+00> : vector<128x128xf32>
    %8 = tpu.matmul %0, %7, %cst_9 {dimension_numbers = #tpu.dot_dimension_numbers<[1], [0], [0], [1], [0, 0, 1, 1], [], []>} : vector<128x128xbf16>, vector<128x128xbf16>, vector<128x128xf32> -> vector<128x128xf32>
    %9 = vector.broadcast %4 : vector<1x128xf32> to vector<128x128xf32>
    %10 = arith.addf %8, %9 : vector<128x128xf32>
    %cst_10 = arith.constant 5.000000e-01 : f32
    %11 = vector.broadcast %cst_10 : f32 to vector<128x128xf32>
    %12 = arith.mulf %11, %10 : vector<128x128xf32>
    %cst_11 = arith.constant 0.707106769 : f32
    %13 = vector.broadcast %cst_11 : f32 to vector<128x128xf32>
    %14 = arith.mulf %10, %13 : vector<128x128xf32>
    %15 = math.erf %14 : vector<128x128xf32>
    %cst_12 = arith.constant 1.000000e+00 : f32
    %16 = vector.broadcast %cst_12 : f32 to vector<128x128xf32>
    %17 = arith.addf %16, %15 : vector<128x128xf32>
    %18 = arith.mulf %12, %17 : vector<128x128xf32>
    %19 = arith.truncf %18 : vector<128x128xf32> to vector<128x128xbf16>
    %cst_13 = arith.constant dense<0.000000e+00> : vector<128x128xf32>
    %20 = tpu.matmul %19, %3, %cst_13 {dimension_numbers = #tpu.dot_dimension_numbers<[1], [0], [0], [1], [0, 0, 1, 1], [], []>} : vector<128x128xbf16>, vector<128x128xbf16>, vector<128x128xf32> -> vector<128x128xf32>
    %21 = arith.truncf %20 : vector<128x128xf32> to vector<128x128xbf16>
    %cst_14 = arith.constant dense<0.000000e+00> : vector<128x128xf32>
    %22 = tpu.matmul %0, %21, %cst_14 {dimension_numbers = #tpu.dot_dimension_numbers<[1], [0], [0], [1], [0, 0, 1, 1], [], []>} : vector<128x128xbf16>, vector<128x128xbf16>, vector<128x128xf32> -> vector<128x128xf32>
    %23 = vector.broadcast %5 : vector<1x128xf32> to vector<128x128xf32>
    %24 = arith.addf %22, %23 : vector<128x128xf32>
    %c0_15 = arith.constant 0 : index
    %c0_16 = arith.constant 0 : index
    %25 = vector.load %arg4[%c0_15, %c0_16] : memref<128x128xf32, #tpu.memory_space<vmem>>, vector<128x128xf32>
    tpu.vector_store %arg4[%c0_15, %c0_16], %24 {strides = array<i32>} : memref<128x128xf32, #tpu.memory_space<vmem>>, vector<128x128xf32>,
    return
  }
}

</mosaic_0001>

<bundles_post_ra>
// kernel: gcn_net.1
= control target key start
LH: loop header
LB: loop body
LE: loop exit
PB: predicated region body
PF: predicated region fallthrough
CT: control target
= control target key end

     0   :  { %vm134_vm0 = vcmask 1043456   ;;  %vm109_vm1 = vcmask 64512   ;;  %s1264_s2 = inlined_call_operand.vmem [shape: bf16[144,128], index: 2, kind: input, shape index: {}]   ;;  %s1265_s1 = inlined_call_operand.vmem [shape: bf16[128,8], index: 1, kind: input, shape index: {}]   ;;  %s1266_s0 = inlined_call_operand.vmem [shape: bf16[128,128], index: 0, kind: input, shape index: {}]   ;;  %s1267_s3 = inlined_call_operand.vmem [shape: f32[8,128], index: 3, kind: input, shape index: {}]   ;;  %s1268_s4 = inlined_call_operand.vmem [shape: f32[128,128], index: 4, kind: output, shape index: {}]  }
   0x1   :  { %v50_v0 = vld [vmem:[%s1264_s2] sm:$0xf]  ;;  %v977_v3 = vld [vmem:[%s1265_s1 + $0x8] sm:$0xff]   ;;  %v978_v4 = vld [vmem:[%s1265_s1 + $0x10] sm:$0xff]  }
   0x2   :  { %975 = vmatprep.subr.msk.bf16.mxu0 %vm134_vm0, %v50_v0  ;;  %v136_v1 = vsel %vm134_vm0, %v50_v0, 0  ;;  %v976_v2 = vld [vmem:[%s1265_s1] sm:$0xff]   ;;  %v979_v5 = vld [vmem:[%s1265_s1 + $0x18] sm:$0xff]   ;;  %v981_v7 = vld [vmem:[%s1265_s1 + $0x28] sm:$0xff]  }
   0x3   :  { %846 = vmatpush3.bf16.msra.mxu0 %v136_v1  ;;  %847 = vmatprep.mubr.msk.bf16.mxu0 %vm109_vm1, %v976_v2  ;;  %v980_v6 = vld [vmem:[%s1265_s1 + $0x20] sm:$0xff]   ;;  %v982_v8 = vld [vmem:[%s1265_s1 + $0x30] sm:$0xff]   ;;  %v983_v9 = vld [vmem:[%s1265_s1 + $0x38] sm:$0xff]  }
   0x4   :  { %v1095_v10 = vld [vmem:[%s1266_s0] sm:$0xff]   ;;  %v1101_v35 = vld [vmem:[%s1266_s0 + $0x8] sm:$0xff]   ;;  %v986_v36 = vld [vmem:[%s1266_s0 + $0x10] sm:$0xff]  }
   0x5   :  { %879 = vmatprep.mubr.bf16.mxu1 %v1095_v10  ;;  %v1110_v37 = vld [vmem:[%s1266_s0 + $0x18] sm:$0xff]   ;;  %v1115_v38 = vld [vmem:[%s1266_s0 + $0x20] sm:$0xff]   ;;  %v1122_v39 = vld [vmem:[%s1266_s0 + $0x28] sm:$0xff]  }
   0x6   :  { %848 = vmatmul.mubr.msk.bf16.vlgmr.msra.gmra.mxu0 %vm109_vm1, %v977_v3  ;;  %v1127_v40 = vld [vmem:[%s1266_s0 + $0x30] sm:$0xff]   ;;  %v1134_v41 = vld [vmem:[%s1266_s0 + $0x38] sm:$0xff]   ;;  %v992_v42 = vld [vmem:[%s1264_s2 + $0x40] sm:$0xff]  }
   0x7   :  { %851 = vmatprep.mubr.msk.bf16.mxu0 %vm109_vm1, %v978_v4  ;;  %895 = vmatprep.subr.bf16.mxu0 %v992_v42  ;;  %v993_v43 = vld [vmem:[%s1264_s2 + $0x38] sm:$0xff]   ;;  %v994_v44 = vld [vmem:[%s1264_s2 + $0x30] sm:$0xff]   ;;  %v995_v45 = vld [vmem:[%s1264_s2 + $0x28] sm:$0xff]  }
   0x8   :  { %896 = vmatpush3.bf16.msra.mxu0 %v992_v42  ;;  %v996_v46 = vld [vmem:[%s1264_s2 + $0x20] sm:$0xff]   ;;  %v997_v47 = vld [vmem:[%s1264_s2 + $0x18] sm:$0xff]   ;;  %v998_v48 = vld [vmem:[%s1264_s2 + $0x10] sm:$0xff]  }
   0x9   :  { %897 = vmatprep.subr.bf16.mxu0 %v993_v43  ;;  %v999_v49 = vld [vmem:[%s1264_s2 + $0x8] sm:$0xff]   ;;  %v1164_v50 = vld [vmem:[%s1267_s3] ss:$0 sm:$0xff] }
   0xc   :  { %898 = vmatpush3.bf16.msra.mxu0 %v993_v43 }
   0xd   :  { %899 = vmatprep.subr.bf16.mxu0 %v994_v44 }
   0xe   :  { %852 = vmatmul.mubr.msk.bf16.gmra.mxu0 %vm109_vm1, %v979_v5 }
   0xf   :  { %855 = vmatprep.mubr.msk.bf16.mxu0 %vm109_vm1, %v980_v6 }
  0x10   :  { %900 = vmatpush3.bf16.msra.mxu0 %v994_v44 }
  0x11   :  { %901 = vmatprep.subr.bf16.mxu0 %v995_v45 }
  0x14   :  { %902 = vmatpush3.bf16.msra.mxu0 %v995_v45 }
  0x15   :  { %903 = vmatprep.subr.bf16.mxu0 %v996_v46 }
  0x16   :  { %856 = vmatmul.mubr.msk.bf16.gmra.mxu0 %vm109_vm1, %v981_v7 }
  0x17   :  { %859 = vmatprep.mubr.msk.bf16.mxu0 %vm109_vm1, %v982_v8 }
  0x18   :  { %904 = vmatpush3.bf16.msra.mxu0 %v996_v46 }
  0x19   :  { %905 = vmatprep.subr.bf16.mxu0 %v997_v47 }
  0x1c   :  { %906 = vmatpush3.bf16.msra.mxu0 %v997_v47 }
  0x1d   :  { %907 = vmatprep.subr.bf16.mxu0 %v998_v48 }
  0x1e   :  { %860 = vmatmul.mubr.msk.bf16.gmra.mxu0 %vm109_vm1, %v983_v9 }
  0x20   :  { %908 = vmatpush3.bf16.msra.mxu0 %v998_v48 }
  0x21   :  { %909 = vmatprep.subr.bf16.mxu0 %v999_v49 }
  0x24   :  { %910 = vmatpush3.bf16.msra.mxu0 %v999_v49 }
  0xc6   :  { %v849_v11 = vpop.f32.mrf.mxu0 }
  0xc8   :  { %v172_v12 = vpop.f32.mrf.mxu0 }
  0xca   :  { %v850_v13 = vpop.f32.mrf.mxu0 }
  0xcb   :  { %v236_v33 = vpack.c.bf16 %v850_v13, %v849_v11 }
  0xcc   :  { %v175_v14 = vpop.f32.mrf.mxu0 }
  0xcd   :  { %v235_v34 = vpack.c.bf16 %v175_v14, %v172_v12 }
  0xce   :  { %v853_v15 = vpop.f32.mrf.mxu0 }
  0xd0   :  { %v188_v16 = vpop.f32.mrf.mxu0 }
  0xd2   :  { %v854_v17 = vpop.f32.mrf.mxu0 }
  0xd3   :  { %v238_v31 = vpack.c.bf16 %v854_v17, %v853_v15 }
  0xd4   :  { %v191_v18 = vpop.f32.mrf.mxu0 }
  0xd5   :  { %v237_v32 = vpack.c.bf16 %v191_v18, %v188_v16 }
  0xd6   :  { %v857_v19 = vpop.f32.mrf.mxu0 }
  0xd8   :  { %v204_v20 = vpop.f32.mrf.mxu0 }
  0xda   :  { %v858_v21 = vpop.f32.mrf.mxu0 }
  0xdb   :  { %v240_v29 = vpack.c.bf16 %v858_v21, %v857_v19 }
  0xdc   :  { %v207_v22 = vpop.f32.mrf.mxu0 }
  0xdd   :  { %v239_v30 = vpack.c.bf16 %v207_v22, %v204_v20 }
  0xde   :  { %v861_v23 = vpop.f32.mrf.mxu0 }
  0xe0   :  { %v220_v24 = vpop.f32.mrf.mxu0 }
  0xe2   :  { %v862_v25 = vpop.f32.mrf.mxu0 }
  0xe3   :  { %v242_v26 = vpack.c.bf16 %v862_v25, %v861_v23 }
  0xe4   :  { %v223_v27 = vpop.f32.mrf.mxu0 }
  0xe5   :  { %v241_v28 = vpack.c.bf16 %v223_v27, %v220_v24  ;;  %863 = vmatprep.subr.bf16.mxu1 %v242_v26 }
  0xe6   :  { %864 = vmatpush3.bf16.msra.mxu1 %v242_v26 }
  0xe7   :  { %865 = vmatprep.subr.bf16.mxu1 %v241_v28 }
  0xea   :  { %866 = vmatpush3.bf16.msra.mxu1 %v241_v28 }
  0xeb   :  { %867 = vmatprep.subr.bf16.mxu1 %v240_v29 }
  0xee   :  { %868 = vmatpush3.bf16.msra.mxu1 %v240_v29 }
  0xef   :  { %869 = vmatprep.subr.bf16.mxu1 %v239_v30 }
  0xf2   :  { %870 = vmatpush3.bf16.msra.mxu1 %v239_v30 }
  0xf3   :  { %871 = vmatprep.subr.bf16.mxu1 %v238_v31 }
  0xf6   :  { %872 = vmatpush3.bf16.msra.mxu1 %v238_v31 }
  0xf7   :  { %873 = vmatprep.subr.bf16.mxu1 %v237_v32 }
  0xfa   :  { %874 = vmatpush3.bf16.msra.mxu1 %v237_v32 }
  0xfb   :  { %875 = vmatprep.subr.bf16.mxu1 %v236_v33 }
  0xfe   :  { %876 = vmatpush3.bf16.msra.mxu1 %v236_v33 }
  0xff   :  { %877 = vmatprep.subr.bf16.mxu1 %v235_v34 }
 0x102   :  { %878 = vmatpush3.bf16.msra.mxu1 %v235_v34 }
 0x105   :  { %880 = vmatmul.mubr.bf16.vlgmr.msra.gmra.mxu1 %v1101_v35 }
 0x106   :  { %883 = vmatprep.mubr.bf16.mxu1 %v986_v36 }
 0x10d   :  { %884 = vmatmul.mubr.bf16.gmra.mxu1 %v1110_v37 }
 0x10e   :  { %887 = vmatprep.mubr.bf16.mxu1 %v1115_v38 }
 0x115   :  { %888 = vmatmul.mubr.bf16.gmra.mxu1 %v1122_v39 }
 0x116   :  { %891 = vmatprep.mubr.bf16.mxu1 %v1127_v40 }
 0x11d   :  { %892 = vmatmul.mubr.bf16.gmra.mxu1 %v1134_v41 }
 0x11e   :  { %947 = vmatprep.mubr.bf16.mxu1 %v986_v36 }
 0x1c5   :  { %v881_v51 = vpop.f32.mrf.mxu1 }
 0x1c6   :  { %v338_v52 = vadd.f32 %v881_v51, %v1164_v50 }
 0x1c7   :  { %v329_v53 = vpop.f32.mrf.mxu1 }
 0x1c8   :  { %v330_v54 = vadd.f32 %v1164_v50, %v329_v53  ;;  %v410_v55 = vmul.f32 0.70710677, %v338_v52  ;;  %v394_v42 = vmul.f32 0.5, %v338_v52 }
 0x1c9   :  { %v882_v56 = vpop.f32.mrf.mxu1 }
 0x1ca   :  { %v408_v57 = vmul.f32 0.70710677, %v330_v54  ;;  %v341_v58 = vadd.f32 %v882_v56, %v1164_v50  ;;  %v392_v22 = vmul.f32 0.5, %v330_v54 }
 0x1cb   :  { %v332_v59 = vpop.f32.mrf.mxu1 }
 0x1cc   :  { %1000 = verf.f32 %v408_v57  ;;  %v411_v60 = vmul.f32 0.70710677, %v341_v58  ;;  %v333_v61 = vadd.f32 %v1164_v50, %v332_v59  ;;  %v395_v30 = vmul.f32 0.5, %v341_v58 }
 0x1cd   :  { %1002 = verf.f32 %v410_v55  ;;  %v885_v62 = vpop.f32.mrf.mxu1 }
 0x1ce   :  { %1004 = verf.f32 %v411_v60  ;;  %v409_v63 = vmul.f32 0.70710677, %v333_v61  ;;  %v1171_v0 = vadd.f32 %v885_v62, %v1164_v50  ;;  %v393_v33 = vmul.f32 0.5, %v333_v61 }
 0x1cf   :  { %v345_v1 = vpop.f32.mrf.mxu1 }
 0x1d0   :  { %1006 = verf.f32 %v409_v63  ;;  %v1174_v2 = vadd.f32 %v1164_v50, %v345_v1  ;;  %v414_v3 = vmul.f32 0.70710677, %v1171_v0 }
 0x1d1   :  { %v886_v4 = vpop.f32.mrf.mxu1 }
 0x1d2   :  { %v412_v5 = vmul.f32 0.70710677, %v1174_v2  ;;  %v357_v6 = vadd.f32 %v886_v4, %v1164_v50 }
 0x1d3   :  { %v348_v7 = vpop.f32.mrf.mxu1 }
 0x1d4   :  { %1008 = verf.f32 %v412_v5  ;;  %v415_v8 = vmul.f32 0.70710677, %v357_v6  ;;  %v349_v9 = vadd.f32 %v1164_v50, %v348_v7  ;;  %v399_v4 = vmul.f32 0.5, %v357_v6 }
 0x1d5   :  { %1010 = verf.f32 %v414_v3  ;;  %v889_v11 = vpop.f32.mrf.mxu1  ;;  %v396_v7 = vmul.f32 0.5, %v1174_v2 }
 0x1d6   :  { %1012 = verf.f32 %v415_v8  ;;  %v413_v12 = vmul.f32 0.70710677, %v349_v9  ;;  %v1181_v13 = vadd.f32 %v889_v11, %v1164_v50  ;;  %v397_v8 = vmul.f32 0.5, %v349_v9 }
 0x1d7   :  { %v361_v14 = vpop.f32.mrf.mxu1 }
 0x1d8   :  { %1014 = verf.f32 %v413_v12  ;;  %v418_v15 = vmul.f32 0.70710677, %v1181_v13  ;;  %v1185_v17 = vadd.f32 %v1164_v50, %v361_v14  ;;  %v398_v12 = vmul.f32 0.5, %v1171_v0 }
 0x1d9   :  { %v1001_v16 = vpop.eup %1000  ;;  %v890_v18 = vpop.f32.mrf.mxu1 }
 0x1da   :  { %v1003_v19 = vpop.eup %1002  ;;  %v1188_v20 = vadd.f32 %v890_v18, %v1164_v50  ;;  %v416_v23 = vmul.f32 0.70710677, %v1185_v17  ;;  %v440_v25 = vadd.f32 1.0, %v1001_v16  ;;  %1016 = verf.f32 %v418_v15 }
 0x1db   :  { %v1005_v21 = vpop.eup %1004  ;;  %v364_v24 = vpop.f32.mrf.mxu1  ;;  %v442_v29 = vadd.f32 1.0, %v1003_v19  ;;  %v400_v0 = vmul.f32 0.5, %v1185_v17 }
 0x1dc   :  { %v443_v26 = vadd.f32 1.0, %v1005_v21  ;;  %v419_v27 = vmul.f32 0.70710677, %v1188_v20  ;;  %1018 = verf.f32 %v416_v23  ;;  %v365_v31 = vadd.f32 %v1164_v50, %v364_v24 }
 0x1dd   :  { %v1007_v28 = vpop.eup %1006  ;;  %v893_v32 = vpop.f32.mrf.mxu1  ;;  %v456_v46 = vmul.f32 %v440_v25, %v392_v22  ;;  %v458_v49 = vmul.f32 %v442_v29, %v394_v42  ;;  %v402_v29 = vmul.f32 0.5, %v1181_v13 }
 0x1de   :  { %v441_v34 = vadd.f32 1.0, %v1007_v28  ;;  %1020 = verf.f32 %v419_v27  ;;  %v1194_v36 = vadd.f32 %v893_v32, %v1164_v50  ;;  %v459_v43 = vmul.f32 %v443_v26, %v395_v30 }
 0x1df   :  { %v417_v44 = vmul.f32 0.70710677, %v365_v31  ;;  %v377_v45 = vpop.f32.mrf.mxu1  ;;  %v403_v26 = vmul.f32 0.5, %v1188_v20  ;;  %v401_v27 = vmul.f32 0.5, %v365_v31 }
 0x1e0   :  { %v457_v47 = vmul.f32 %v441_v34, %v393_v33  ;;  %v422_v51 = vmul.f32 0.70710677, %v1194_v36  ;;  %v378_v53 = vadd.f32 %v1164_v50, %v377_v45  ;;  %v473_v59 = vpack.c.bf16 %v459_v43, %v458_v49 }
 0x1e1   :  { %v1009_v48 = vpop.eup %1008  ;;  %1022 = verf.f32 %v417_v44  ;;  %v894_v54 = vpop.f32.mrf.mxu1  ;;  %v406_v13 = vmul.f32 0.5, %v1194_v36 }
 0x1e2   :  { %v1011_v55 = vpop.eup %1010  ;;  %v389_v56 = vadd.f32 %v894_v54, %v1164_v50  ;;  %v472_v57 = vpack.c.bf16 %v457_v47, %v456_v46  ;;  %v420_v52 = vmul.f32 0.70710677, %v378_v53  ;;  %v444_v61 = vadd.f32 1.0, %v1009_v48 }
 0x1e3   :  { %v1013_v58 = vpop.eup %1012  ;;  %v380_v60 = vpop.f32.mrf.mxu1  ;;  %1024 = verf.f32 %v422_v51  ;;  %v446_v3 = vadd.f32 1.0, %v1011_v55  ;;  %v404_v17 = vmul.f32 0.5, %v378_v53 }
 0x1e4   :  { %v447_v62 = vadd.f32 1.0, %v1013_v58  ;;  %v423_v63 = vmul.f32 0.70710677, %v389_v56  ;;  %911 = vmatprep.mubr.bf16.mxu0 %v472_v57  ;;  %1026 = verf.f32 %v420_v52  ;;  %v381_v5 = vadd.f32 %v1164_v50, %v380_v60 }
 0x1e5   :  { %v1015_v1 = vpop.eup %1014  ;;  %912 = vmatmul.mubr.bf16.vlgmr.msra.gmra.mxu0 %v473_v59  ;;  %v460_v16 = vmul.f32 %v444_v61, %v396_v7  ;;  %v462_v21 = vmul.f32 %v446_v3, %v398_v12  ;;  %v407_v51 = vmul.f32 0.5, %v389_v56 }
 0x1e6   :  { %v445_v11 = vadd.f32 1.0, %v1015_v1  ;;  %1028 = verf.f32 %v423_v63  ;;  %v463_v14 = vmul.f32 %v447_v62, %v399_v4  ;;  %v421_v15 = vmul.f32 0.70710677, %v381_v5 }
 0x1e7   :  { %v1017_v19 = vpop.eup %1016  ;;  %v405_v31 = vmul.f32 0.5, %v381_v5 }
 0x1e8   :  { %v461_v18 = vmul.f32 %v445_v11, %v397_v8  ;;  %1030 = verf.f32 %v421_v15  ;;  %v475_v24 = vpack.c.bf16 %v463_v14, %v462_v21  ;;  %v450_v9 = vadd.f32 1.0, %v1017_v19 }
 0x1e9   :  { %v1019_v22 = vpop.eup %1018 }
 0x1ea   :  { %v474_v6 = vpack.c.bf16 %v461_v18, %v460_v16  ;;  %v448_v25 = vadd.f32 1.0, %v1019_v22  ;;  %v466_v43 = vmul.f32 %v450_v9, %v402_v29 }
 0x1eb   :  { %v1021_v23 = vpop.eup %1020 }
 0x1ec   :  { %v451_v50 = vadd.f32 1.0, %v1021_v23  ;;  %915 = vmatprep.mubr.bf16.mxu0 %v474_v6  ;;  %v464_v33 = vmul.f32 %v448_v25, %v400_v0 }
 0x1ed   :  { %916 = vmatmul.mubr.bf16.gmra.mxu0 %v475_v24  ;;  %v787_v24 = vld [vmem:[%s1267_s3 + $0x1] ss:$0 sm:$0xff] }
 0x1ee   :  { %v1023_v2 = vpop.eup %1022  ;;  %v467_v30 = vmul.f32 %v451_v50, %v403_v26 }
 0x1ef   :  { %v449_v28 = vadd.f32 1.0, %v1023_v2 }
 0x1f0   :  { %v1025_v32 = vpop.eup %1024  ;;  %v477_v47 = vpack.c.bf16 %v467_v30, %v466_v43 }
 0x1f1   :  { %v465_v34 = vmul.f32 %v449_v28, %v401_v27  ;;  %v1027_v42 = vpop.eup %1026  ;;  %v454_v20 = vadd.f32 1.0, %v1025_v32 }
 0x1f2   :  { %v452_v48 = vadd.f32 1.0, %v1027_v42 }
 0x1f3   :  { %v1029_v44 = vpop.eup %1028  ;;  %v476_v45 = vpack.c.bf16 %v465_v34, %v464_v33  ;;  %v470_v59 = vmul.f32 %v454_v20, %v406_v13 }
 0x1f4   :  { %v455_v46 = vadd.f32 1.0, %v1029_v44  ;;  %v468_v57 = vmul.f32 %v452_v48, %v404_v17 }
 0x1f5   :  { %919 = vmatprep.mubr.bf16.mxu0 %v476_v45  ;;  %v1031_v49 = vpop.eup %1030 }
 0x1f6   :  { %920 = vmatmul.mubr.bf16.gmra.mxu0 %v477_v47  ;;  %v453_v54 = vadd.f32 1.0, %v1031_v49  ;;  %v471_v55 = vmul.f32 %v455_v46, %v407_v51 }
 0x1f8   :  { %v469_v58 = vmul.f32 %v453_v54, %v405_v31  ;;  %v479_v60 = vpack.c.bf16 %v471_v55, %v470_v59 }
 0x1fa   :  { %v478_v52 = vpack.c.bf16 %v469_v58, %v468_v57 }
 0x1fc   :  { %923 = vmatprep.mubr.bf16.mxu0 %v478_v52 }
 0x1fe   :  { %924 = vmatmul.mubr.bf16.gmra.mxu0 %v479_v60 }
 0x1ff   :  { %943 = vmatprep.mubr.bf16.mxu0 %v1095_v10 }
 0x2a5   :  { %v913_v61 = vpop.f32.mrf.mxu0 }
 0x2a7   :  { %v562_v62 = vpop.f32.mrf.mxu0 }
 0x2a9   :  { %v914_v63 = vpop.f32.mrf.mxu0 }
 0x2aa   :  { %v626_v6 = vpack.c.bf16 %v914_v63, %v913_v61 }
 0x2ab   :  { %v565_v56 = vpop.f32.mrf.mxu0 }
 0x2ac   :  { %v625_v23 = vpack.c.bf16 %v565_v56, %v562_v62 }
 0x2ad   :  { %v917_v1 = vpop.f32.mrf.mxu0 }
 0x2af   :  { %v578_v53 = vpop.f32.mrf.mxu0 }
 0x2b1   :  { %v918_v3 = vpop.f32.mrf.mxu0 }
 0x2b2   :  { %v628_v21 = vpack.c.bf16 %v918_v3, %v917_v1 }
 0x2b3   :  { %v581_v4 = vpop.f32.mrf.mxu0 }
 0x2b4   :  { %v627_v22 = vpack.c.bf16 %v581_v4, %v578_v53 }
 0x2b6   :  { %v921_v5 = vpop.f32.mrf.mxu0 }
 0x2b8   :  { %v594_v36 = vpop.f32.mrf.mxu0 }
 0x2ba   :  { %v922_v7 = vpop.f32.mrf.mxu0 }
 0x2bb   :  { %v630_v10 = vpack.c.bf16 %v922_v7, %v921_v5 }
 0x2bc   :  { %v597_v8 = vpop.f32.mrf.mxu0 }
 0x2bd   :  { %v629_v19 = vpack.c.bf16 %v597_v8, %v594_v36 }
 0x2be   :  { %v925_v11 = vpop.f32.mrf.mxu0 }
 0x2c0   :  { %v610_v12 = vpop.f32.mrf.mxu0 }
 0x2c2   :  { %v926_v14 = vpop.f32.mrf.mxu0 }
 0x2c3   :  { %v632_v15 = vpack.c.bf16 %v926_v14, %v925_v11 }
 0x2c4   :  { %v613_v16 = vpop.f32.mrf.mxu0 }
 0x2c5   :  { %v631_v18 = vpack.c.bf16 %v613_v16, %v610_v12  ;;  %927 = vmatprep.subr.bf16.mxu0 %v632_v15  ;;  %959 = vmatprep.subr.bf16.mxu1 %v632_v15 }
 0x2c6   :  { %928 = vmatpush3.bf16.msra.mxu0 %v632_v15  ;;  %967 = vmatpush3.bf16.msra.mxu1 %v632_v15 }
 0x2c7   :  { %929 = vmatprep.subr.bf16.mxu0 %v631_v18  ;;  %960 = vmatprep.subr.bf16.mxu1 %v631_v18 }
 0x2ca   :  { %930 = vmatpush3.bf16.msra.mxu0 %v631_v18  ;;  %968 = vmatpush3.bf16.msra.mxu1 %v631_v18 }
 0x2cb   :  { %931 = vmatprep.subr.bf16.mxu0 %v630_v10  ;;  %961 = vmatprep.subr.bf16.mxu1 %v630_v10 }
 0x2ce   :  { %932 = vmatpush3.bf16.msra.mxu0 %v630_v10  ;;  %969 = vmatpush3.bf16.msra.mxu1 %v630_v10 }
 0x2cf   :  { %933 = vmatprep.subr.bf16.mxu0 %v629_v19  ;;  %962 = vmatprep.subr.bf16.mxu1 %v629_v19 }
 0x2d2   :  { %934 = vmatpush3.bf16.msra.mxu0 %v629_v19  ;;  %970 = vmatpush3.bf16.msra.mxu1 %v629_v19 }
 0x2d3   :  { %935 = vmatprep.subr.bf16.mxu0 %v628_v21  ;;  %963 = vmatprep.subr.bf16.mxu1 %v628_v21 }
 0x2d6   :  { %936 = vmatpush3.bf16.msra.mxu0 %v628_v21  ;;  %971 = vmatpush3.bf16.msra.mxu1 %v628_v21 }
 0x2d7   :  { %937 = vmatprep.subr.bf16.mxu0 %v627_v22  ;;  %964 = vmatprep.subr.bf16.mxu1 %v627_v22 }
 0x2da   :  { %938 = vmatpush3.bf16.msra.mxu0 %v627_v22  ;;  %972 = vmatpush3.bf16.msra.mxu1 %v627_v22 }
 0x2db   :  { %939 = vmatprep.subr.bf16.mxu0 %v626_v6  ;;  %965 = vmatprep.subr.bf16.mxu1 %v626_v6 }
 0x2de   :  { %940 = vmatpush3.bf16.msra.mxu0 %v626_v6  ;;  %973 = vmatpush3.bf16.msra.mxu1 %v626_v6 }
 0x2df   :  { %941 = vmatprep.subr.bf16.mxu0 %v625_v23  ;;  %966 = vmatprep.subr.bf16.mxu1 %v625_v23 }
 0x2e2   :  { %942 = vmatpush3.bf16.msra.mxu0 %v625_v23  ;;  %974 = vmatpush3.bf16.msra.mxu1 %v625_v23 }
 0x2e5   :  { %948 = vmatmul.mubr.bf16.vlgmr.msra.gmra.mxu1 %v1110_v37  ;;  %944 = vmatmul.mubr.bf16.vlgmr.msra.gmra.mxu0 %v1101_v35 }
 0x2e6   :  { %951 = vmatprep.mubr.bf16.mxu1 %v1115_v38 }
 0x2ed   :  { %952 = vmatmul.mubr.bf16.gmra.mxu1 %v1122_v39 }
 0x2ee   :  { %955 = vmatprep.mubr.bf16.mxu1 %v1127_v40 }
 0x2f5   :  { %956 = vmatmul.mubr.bf16.gmra.mxu1 %v1134_v41 }
 0x3a5   :  { %v949_v50 = vpop.f32.mrf.mxu1  ;;  %v945_v25 = vpop.f32.mrf.mxu0 }
 0x3a6   :  { %v696_v2 = vadd.f32 %v949_v50, %v787_v24  ;;  %v680_v9 = vadd.f32 %v945_v25, %v787_v24 }
 0x3a7   :  { %v687_v26 = vpop.f32.mrf.mxu1  ;;  %v671_v37 = vpop.f32.mrf.mxu0 }
 0x3a8   :  { %740 = vst [vmem:[%s1268_s4 + $0x30] sm:$0xff] %v696_v2  ;;  %v688_v35 = vadd.f32 %v787_v24, %v687_v26  ;;  %736 = vst [vmem:[%s1268_s4 + $0x10] sm:$0xff] %v680_v9  ;;  %v672_v38 = vadd.f32 %v787_v24, %v671_v37 }
 0x3a9   :  { %v950_v39 = vpop.f32.mrf.mxu1  ;;  %v946_v40 = vpop.f32.mrf.mxu0 }
 0x3aa   :  { %738 = vst [vmem:[%s1268_s4 + $0x20] sm:$0xff] %v688_v35  ;;  %v699_v41 = vadd.f32 %v950_v39, %v787_v24  ;;  %734 = vst [vmem:[%s1268_s4] sm:$0xff] %v672_v38  ;;  %v683_v0 = vadd.f32 %v946_v40, %v787_v24 }
 0x3ab   :  { %v690_v27 = vpop.f32.mrf.mxu1  ;;  %v674_v28 = vpop.f32.mrf.mxu0 }
 0x3ac   :  { %741 = vst [vmem:[%s1268_s4 + $0x38] sm:$0xff] %v699_v41  ;;  %v691_v29 = vadd.f32 %v787_v24, %v690_v27  ;;  %737 = vst [vmem:[%s1268_s4 + $0x18] sm:$0xff] %v683_v0  ;;  %v675_v30 = vadd.f32 %v787_v24, %v674_v28 }
 0x3ad   :  { %v953_v32 = vpop.f32.mrf.mxu1 }
 0x3ae   :  { %739 = vst [vmem:[%s1268_s4 + $0x28] sm:$0xff] %v691_v29  ;;  %v712_v33 = vadd.f32 %v953_v32, %v787_v24  ;;  %735 = vst [vmem:[%s1268_s4 + $0x8] sm:$0xff] %v675_v30 }
 0x3af   :  { %v703_v34 = vpop.f32.mrf.mxu1 }
 0x3b0   :  { %744 = vst [vmem:[%s1268_s4 + $0x50] sm:$0xff] %v712_v33  ;;  %v704_v42 = vadd.f32 %v787_v24, %v703_v34 }
 0x3b1   :  { %v954_v43 = vpop.f32.mrf.mxu1 }
 0x3b2   :  { %742 = vst [vmem:[%s1268_s4 + $0x40] sm:$0xff] %v704_v42  ;;  %v715_v44 = vadd.f32 %v954_v43, %v787_v24 }
 0x3b3   :  { %v706_v45 = vpop.f32.mrf.mxu1 }
 0x3b4   :  { %745 = vst [vmem:[%s1268_s4 + $0x58] sm:$0xff] %v715_v44  ;;  %v707_v46 = vadd.f32 %v787_v24, %v706_v45 }
 0x3b5   :  { %v957_v47 = vpop.f32.mrf.mxu1 }
 0x3b6   :  { %743 = vst [vmem:[%s1268_s4 + $0x48] sm:$0xff] %v707_v46  ;;  %v728_v48 = vadd.f32 %v957_v47, %v787_v24 }
 0x3b7   :  { %v719_v49 = vpop.f32.mrf.mxu1 }
 0x3b8   :  { %748 = vst [vmem:[%s1268_s4 + $0x70] sm:$0xff] %v728_v48  ;;  %v720_v20 = vadd.f32 %v787_v24, %v719_v49 }
 0x3b9   :  { %v958_v51 = vpop.f32.mrf.mxu1 }
 0x3ba   :  { %746 = vst [vmem:[%s1268_s4 + $0x60] sm:$0xff] %v720_v20  ;;  %v731_v17 = vadd.f32 %v958_v51, %v787_v24 }
 0x3bb   :  { %v722_v31 = vpop.f32.mrf.mxu1 }
 0x3bc   :  { %749 = vst [vmem:[%s1268_s4 + $0x78] sm:$0xff] %v731_v17  ;;  %v723_v54 = vadd.f32 %v787_v24, %v722_v31 }
 0x3be   :  { %747 = vst [vmem:[%s1268_s4 + $0x68] sm:$0xff] %v723_v54 }

</bundles_post_ra>
